<compile_context>
chip_gen: v6e
topology: v6e:2x2x1
jax: 0.10.0
libtpu: 0.0.40
codegen_flags: <defaults>
</compile_context>

<pallas_src>
import functools

import jax
import jax.numpy as jnp
from jax import lax
from jax.experimental import pallas as pl
from jax.experimental.pallas import tpu as pltpu


def _leaky(v, slope=0.01):
    # nn.LeakyReLU() default negative_slope = 0.01
    return jnp.where(v >= 0, v, slope * v)


def _make_kernel(B, L1, L2, L3, Cin, C, Cout):
    """Build the fused kernel; all shape parameters are baked in as Python ints."""
    r_w1 = 3 * Cin            # rows [0, r_w1)           : w1 (im2col-flattened)
    r_w21 = r_w1 + 3 * C      # rows [r_w1, r_w21)       : w21 taps 0..2 stacked
    r_w22 = r_w21 + C         # rows [r_w21, r_w22)      : w22 (pointwise)
    r_w31 = r_w22 + 3 * C     # rows [r_w22, r_w31)      : w31 taps 0..2 stacked
    r_w32 = r_w31 + C         # rows [r_w31, r_w32)      : w32 (pointwise)

    def kernel(xw_ref, wA_ref, w4_ref, b_ref, out_ref):
        dot = functools.partial(jnp.dot, preferred_element_type=jnp.float32)

        # --- static views into the stacked weight slab ---
        w1f = wA_ref[0:r_w1, :]                                        # (3*Cin, C)
        w21 = [wA_ref[r_w1 + k * C: r_w1 + (k + 1) * C, :] for k in range(3)]
        w22t = wA_ref[r_w21:r_w22, :]                                  # (C, C)
        w31 = [wA_ref[r_w22 + k * C: r_w22 + (k + 1) * C, :] for k in range(3)]
        w32t = wA_ref[r_w31:r_w32, :]                                  # (C, C)
        w4t = w4_ref[...]                                              # (C, Cout)

        b1 = b_ref[0:1, 0:C]
        b21 = b_ref[1:2, 0:C]
        b22 = b_ref[2:3, 0:C]
        b31 = b_ref[3:4, 0:C]
        b32 = b_ref[4:5, 0:C]
        b4 = b_ref[5:6, 0:Cout]

        # ---- layer 1: conv k=3, s=3 == one matmul on host-side im2col windows ----
        xw = xw_ref[...]                                               # (B*L1, 3*Cin)
        y1 = _leaky(dot(xw, w1f) + b1)                                 # (B*L1, C)

        # trim per-batch tail rows if L1 is not a multiple of 3 (keeps lane dim intact)
        if L1 != 3 * L2:
            y1 = y1.reshape(B, L1, C)[:, :3 * L2, :].reshape(B * 3 * L2, C)

        # residual y1[:, :, 1::3]: middle row of each 3-row group
        y1_slice = y1.reshape(B * L2, 3, C)[:, 1, :]                   # (B*L2, C)

        # ---- layer 2: conv k=3, s=3 via 3 full-height tap matmuls + group-select ----
        z = [dot(y1, w21[k]).reshape(B * L2, 3, C)[:, k, :] for k in range(3)]
        y2 = _leaky(z[0] + z[1] + z[2] + b21)                          # (B*L2, C)
        y2 = dot(y2, w22t) + b22                                       # pointwise w22
        y2 = _leaky(y2 + y1_slice)                                     # (B*L2, C)

        # residual y2[:, :, 1:2]
        y2_slice = y2.reshape(B, L2, C)[:, 1:2, :]                     # (B, 1, C)

        # ---- layer 3: conv k=3, s=1 via 3 full tap matmuls + shifted adds ----
        u = [dot(y2, w31[k]).reshape(B, L2, C) for k in range(3)]
        y3 = u[0][:, 0:L3, :] + u[1][:, 1:1 + L3, :] + u[2][:, 2:2 + L3, :] + b31
        y3 = _leaky(y3)                                                # (B, L3, C)
        y3 = dot(y3.reshape(B * L3, C), w32t) + b32                    # pointwise w32
        y3 = _leaky(y3.reshape(B, L3, C) + y2_slice)                   # (B, L3, C)

        # ---- output projection (pointwise w4), single lane-contiguous store ----
        y4 = dot(y3.reshape(B * L3, C), w4t) + b4                      # (B*L3, Cout)
        out_ref[...] = y4.astype(out_ref.dtype)

    return kernel


def regression_forward(x, params):
    """x: (B, T, input_size) float32 -> same result as Regression.forward(x)."""
    B, T, Cin = x.shape
    (w1, b1), (w21, b21), (w22, b22), (w31, b31), (w32, b32), (w4, b4) = params
    C = w1.shape[0]        # linear_size
    Cout = w4.shape[0]     # output_size

    L1 = (T - 3) // 3 + 1
    L2 = (L1 - 3) // 3 + 1
    L3 = L2 - 2
    assert L3 >= 1, "sequence too short for the w31 conv"
    assert len(range(1, L1, 3)) == L2, \
        "model contract: y1[:, :, 1::3] must match w21 output length"

    # Host-side glue: im2col for w1 (stride==kernel==3 -> pure reshape, (k, cin) order)
    xwin = x[:, :3 * L1, :].reshape(B * L1, 3 * Cin)

    # Weight re-layout from PyTorch (Cout, Cin, K) to matmul layout [k*Cin + c, o].
    w1f = jnp.transpose(w1, (2, 1, 0)).reshape(3 * Cin, C)
    w21s = jnp.transpose(w21, (2, 1, 0)).reshape(3 * C, C)   # tap k = rows [k*C, (k+1)*C)
    w31s = jnp.transpose(w31, (2, 1, 0)).reshape(3 * C, C)
    w22t = w22[:, :, 0].T
    w32t = w32[:, :, 0].T
    w4t = w4[:, :, 0].T

    # Consolidated operands: one weight slab (all C-column weights), one bias pack.
    wA = jnp.concatenate([w1f, w21s, w22t, w31s, w32t], axis=0)       # (3*Cin + 8*C, C)
    Cmax = max(C, Cout)

    def _pad_bias(v):
        v = v.reshape(1, -1)
        return jnp.pad(v, ((0, 0), (0, Cmax - v.shape[1])))

    biases = jnp.concatenate(
        [_pad_bias(b1), _pad_bias(b21), _pad_bias(b22),
         _pad_bias(b31), _pad_bias(b32), _pad_bias(b4)], axis=0)      # (6, Cmax)

    kernel = _make_kernel(B, L1, L2, L3, Cin, C, Cout)

    # Single grid step: batch is folded into the sublane axis; every operand is a
    # full-array block (tiny vs. VMEM on v5e/v6e/v7x), weights resident for the step.
    out = pl.pallas_call(
        kernel,
        out_shape=jax.ShapeDtypeStruct((B * L3, Cout), jnp.float32),
        grid=(1,),
        in_specs=[
            pl.BlockSpec((B * L1, 3 * Cin), lambda i: (0, 0)),   # xwin
            pl.BlockSpec(wA.shape, lambda i: (0, 0)),            # stacked weights
            pl.BlockSpec((C, Cout), lambda i: (0, 0)),           # w4
            pl.BlockSpec((6, Cmax), lambda i: (0, 0)),           # packed biases
        ],
        out_specs=pl.BlockSpec((B * L3, Cout), lambda i: (0, 0)),
        compiler_params=pltpu.CompilerParams(
            dimension_semantics=("arbitrary",)),
    )(xwin, wA, w4t, biases)

    # PyTorch layout: y4 is (B, output_size, L3); then .squeeze()
    y4 = jnp.transpose(out.reshape(B, L3, Cout), (0, 2, 1))
    return jnp.squeeze(y4)


def ref_forward(x, params):
    """Plain-JAX reference mirroring the PyTorch forward (for validation)."""
    (w1, b1), (w21, b21), (w22, b22), (w31, b31), (w32, b32), (w4, b4) = params
    dn = ('NCH', 'OIH', 'NCH')

    def conv(z, w, b_, s):
        o = lax.conv_general_dilated(z, w, (s,), 'VALID', dimension_numbers=dn)
        return o + b_[None, :, None]

    lre = lambda v: jnp.where(v >= 0, v, 0.01 * v)
    xt = jnp.transpose(x, (0, 2, 1))
    y1 = lre(conv(xt, w1, b1, 3))
    y1_slice = y1[:, :, 1::3]
    y2 = lre(conv(y1, w21, b21, 3))
    y2 = conv(y2, w22, b22, 1)
    y2 = lre(y2 + y1_slice)
    y2_slice = y2[:, :, 1:2]
    y3 = lre(conv(y2, w31, b31, 1))
    y3 = conv(y3, w32, b32, 1)
    y3 = lre(y3 + y2_slice)
    y4 = conv(y3, w4, b4, 1)
    return jnp.squeeze(y4)


def init_params(key, input_size, linear_size, output_size):
    """Deterministic init matching PyTorch Conv1d default (uniform +-1/sqrt(fan_in))."""
    def conv_init(k, cout, cin, ksz):
        kw, kb = jax.random.split(k)
        bound = 1.0 / float(cin * ksz) ** 0.5
        w = jax.random.uniform(kw, (cout, cin, ksz), jnp.float32, -bound, bound)
        b_ = jax.random.uniform(kb, (cout,), jnp.float32, -bound, bound)
        return w, b_

    ks = jax.random.split(key, 6)
    return (
        conv_init(ks[0], linear_size, input_size, 3),   # w1
        conv_init(ks[1], linear_size, linear_size, 3),  # w21
        conv_init(ks[2], linear_size, linear_size, 1),  # w22
        conv_init(ks[3], linear_size, linear_size, 3),  # w31
        conv_init(ks[4], linear_size, linear_size, 1),  # w32
        conv_init(ks[5], output_size, linear_size, 1),  # w4
    )


if __name__ == "__main__":
    # T = 27 -> L1 = 9 -> L2 = 3 -> L3 = 1, so both residual adds line up exactly
    # as the original model's sequence-length contract requires.
    B, T = 2, 27
    input_size, linear_size, output_size = 8, 32, 4
    # NOTE: `pad` is an unused ctor arg in the PyTorch forward; nothing to do.

    key = jax.random.PRNGKey(0)
    kx, kp = jax.random.split(key)
    x = jax.random.normal(kx, (B, T, input_size), dtype=jnp.float32)
    params = init_params(kp, input_size, linear_size, output_size)

    out = regression_forward(x, params)
    out = jax.block_until_ready(out)

    ref = jax.block_until_ready(ref_forward(x, params))
    assert out.shape == ref.shape == (B, output_size), (out.shape, ref.shape)
    assert jnp.allclose(out, ref, atol=1e-4, rtol=1e-4), "mismatch vs reference"

    print("KERNEL_OK")
</pallas_src>

<mosaic_0001>
module attributes {stable_mosaic.version = 11 : i64} {
  func.func @kernel(%arg0: i32, %arg1: memref<18x24xf32, #tpu.memory_space<vmem>>, %arg2: memref<280x32xf32, #tpu.memory_space<vmem>>, %arg3: memref<32x4xf32, #tpu.memory_space<vmem>>, %arg4: memref<6x32xf32, #tpu.memory_space<vmem>>, %arg5: memref<2x4xf32, #tpu.memory_space<vmem>>) attributes {dimension_semantics = [#tpu.dimension_semantics<arbitrary>], iteration_bounds = array<i64: 1>, scalar_prefetch = 0 : i64, scratch_operands = 0 : i64, tpu.core_type = #tpu.core_type<tc>, window_params = [{pipeline_mode = #tpu.pipeline_mode<synchronous>, transform_indices = @transform_0, window_bounds = array<i64: 18, 24>}, {pipeline_mode = #tpu.pipeline_mode<synchronous>, transform_indices = @transform_1, window_bounds = array<i64: 280, 32>}, {pipeline_mode = #tpu.pipeline_mode<synchronous>, transform_indices = @transform_2, window_bounds = array<i64: 32, 4>}, {pipeline_mode = #tpu.pipeline_mode<synchronous>, transform_indices = @transform_3, window_bounds = array<i64: 6, 32>}, {pipeline_mode = #tpu.pipeline_mode<synchronous>, transform_indices = @transform_4, window_bounds = array<i64: 2, 4>}]} {
    %c0 = arith.constant 0 : index
    %c0_0 = arith.constant 0 : index
    %0 = vector.load %arg2[%c0, %c0_0] : memref<280x32xf32, #tpu.memory_space<vmem>>, vector<24x32xf32>
    %c24 = arith.constant 24 : index
    %c0_1 = arith.constant 0 : index
    %1 = vector.load %arg2[%c24, %c0_1] : memref<280x32xf32, #tpu.memory_space<vmem>>, vector<32x32xf32>
    %c56 = arith.constant 56 : index
    %c0_2 = arith.constant 0 : index
    %2 = vector.load %arg2[%c56, %c0_2] : memref<280x32xf32, #tpu.memory_space<vmem>>, vector<32x32xf32>
    %c88 = arith.constant 88 : index
    %c0_3 = arith.constant 0 : index
    %3 = vector.load %arg2[%c88, %c0_3] : memref<280x32xf32, #tpu.memory_space<vmem>>, vector<32x32xf32>
    %c120 = arith.constant 120 : index
    %c0_4 = arith.constant 0 : index
    %4 = vector.load %arg2[%c120, %c0_4] : memref<280x32xf32, #tpu.memory_space<vmem>>, vector<32x32xf32>
    %c152 = arith.constant 152 : index
    %c0_5 = arith.constant 0 : index
    %5 = vector.load %arg2[%c152, %c0_5] : memref<280x32xf32, #tpu.memory_space<vmem>>, vector<32x32xf32>
    %c184 = arith.constant 184 : index
    %c0_6 = arith.constant 0 : index
    %6 = vector.load %arg2[%c184, %c0_6] : memref<280x32xf32, #tpu.memory_space<vmem>>, vector<32x32xf32>
    %c216 = arith.constant 216 : index
    %c0_7 = arith.constant 0 : index
    %7 = vector.load %arg2[%c216, %c0_7] : memref<280x32xf32, #tpu.memory_space<vmem>>, vector<32x32xf32>
    %c248 = arith.constant 248 : index
    %c0_8 = arith.constant 0 : index
    %8 = vector.load %arg2[%c248, %c0_8] : memref<280x32xf32, #tpu.memory_space<vmem>>, vector<32x32xf32>
    %c0_9 = arith.constant 0 : index
    %c0_10 = arith.constant 0 : index
    %9 = vector.load %arg3[%c0_9, %c0_10] : memref<32x4xf32, #tpu.memory_space<vmem>>, vector<32x4xf32>
    %c0_11 = arith.constant 0 : index
    %c0_12 = arith.constant 0 : index
    %10 = vector.load %arg4[%c0_11, %c0_12] : memref<6x32xf32, #tpu.memory_space<vmem>>, vector<1x32xf32>
    %c1 = arith.constant 1 : index
    %c0_13 = arith.constant 0 : index
    %11 = vector.load %arg4[%c1, %c0_13] : memref<6x32xf32, #tpu.memory_space<vmem>>, vector<1x32xf32>
    %c2 = arith.constant 2 : index
    %c0_14 = arith.constant 0 : index
    %12 = vector.load %arg4[%c2, %c0_14] : memref<6x32xf32, #tpu.memory_space<vmem>>, vector<1x32xf32>
    %c3 = arith.constant 3 : index
    %c0_15 = arith.constant 0 : index
    %13 = vector.load %arg4[%c3, %c0_15] : memref<6x32xf32, #tpu.memory_space<vmem>>, vector<1x32xf32>
    %c4 = arith.constant 4 : index
    %c0_16 = arith.constant 0 : index
    %14 = vector.load %arg4[%c4, %c0_16] : memref<6x32xf32, #tpu.memory_space<vmem>>, vector<1x32xf32>
    %c5 = arith.constant 5 : index
    %c0_17 = arith.constant 0 : index
    %15 = vector.load %arg4[%c5, %c0_17] : memref<6x32xf32, #tpu.memory_space<vmem>>, vector<1x4xf32>
    %c0_18 = arith.constant 0 : index
    %c0_19 = arith.constant 0 : index
    %16 = vector.load %arg1[%c0_18, %c0_19] : memref<18x24xf32, #tpu.memory_space<vmem>>, vector<18x24xf32>
    %cst = arith.constant dense<0.000000e+00> : vector<18x32xf32>
    %17 = tpu.matmul %16, %0, %cst {dimension_numbers = #tpu.dot_dimension_numbers<[1], [0], [0], [1], [0, 0, 1, 1], [], []>} : vector<18x24xf32>, vector<24x32xf32>, vector<18x32xf32> -> vector<18x32xf32>
    %18 = vector.broadcast %10 : vector<1x32xf32> to vector<18x32xf32>
    %19 = arith.addf %17, %18 : vector<18x32xf32>
    %cst_20 = arith.constant 0.000000e+00 : f32
    %20 = vector.broadcast %cst_20 : f32 to vector<18x32xf32>
    %21 = arith.cmpf oge, %19, %20 : vector<18x32xf32>
    %cst_21 = arith.constant 0.00999999977 : f32
    %22 = vector.broadcast %cst_21 : f32 to vector<18x32xf32>
    %23 = arith.mulf %22, %19 : vector<18x32xf32>
    %24 = arith.select %21, %19, %23 : vector<18x32xi1>, vector<18x32xf32>
    %25 = vector.shape_cast %24 : vector<18x32xf32> to vector<6x3x32xf32>
    %26 = vector.extract_strided_slice %25 {offsets = [0, 1, 0], sizes = [6, 1, 32], strides = [1, 1, 1]} : vector<6x3x32xf32> to vector<6x1x32xf32>
    %27 = vector.shape_cast %26 : vector<6x1x32xf32> to vector<6x32xf32>
    %cst_22 = arith.constant dense<0.000000e+00> : vector<18x32xf32>
    %28 = tpu.matmul %24, %1, %cst_22 {dimension_numbers = #tpu.dot_dimension_numbers<[1], [0], [0], [1], [0, 0, 1, 1], [], []>} : vector<18x32xf32>, vector<32x32xf32>, vector<18x32xf32> -> vector<18x32xf32>
    %29 = vector.shape_cast %28 : vector<18x32xf32> to vector<6x3x32xf32>
    %30 = vector.extract_strided_slice %29 {offsets = [0, 0, 0], sizes = [6, 1, 32], strides = [1, 1, 1]} : vector<6x3x32xf32> to vector<6x1x32xf32>
    %31 = vector.shape_cast %30 : vector<6x1x32xf32> to vector<6x32xf32>
    %cst_23 = arith.constant dense<0.000000e+00> : vector<18x32xf32>
    %32 = tpu.matmul %24, %2, %cst_23 {dimension_numbers = #tpu.dot_dimension_numbers<[1], [0], [0], [1], [0, 0, 1, 1], [], []>} : vector<18x32xf32>, vector<32x32xf32>, vector<18x32xf32> -> vector<18x32xf32>
    %33 = vector.shape_cast %32 : vector<18x32xf32> to vector<6x3x32xf32>
    %34 = vector.extract_strided_slice %33 {offsets = [0, 1, 0], sizes = [6, 1, 32], strides = [1, 1, 1]} : vector<6x3x32xf32> to vector<6x1x32xf32>
    %35 = vector.shape_cast %34 : vector<6x1x32xf32> to vector<6x32xf32>
    %cst_24 = arith.constant dense<0.000000e+00> : vector<18x32xf32>
    %36 = tpu.matmul %24, %3, %cst_24 {dimension_numbers = #tpu.dot_dimension_numbers<[1], [0], [0], [1], [0, 0, 1, 1], [], []>} : vector<18x32xf32>, vector<32x32xf32>, vector<18x32xf32> -> vector<18x32xf32>
    %37 = vector.shape_cast %36 : vector<18x32xf32> to vector<6x3x32xf32>
    %38 = vector.extract_strided_slice %37 {offsets = [0, 2, 0], sizes = [6, 1, 32], strides = [1, 1, 1]} : vector<6x3x32xf32> to vector<6x1x32xf32>
    %39 = vector.shape_cast %38 : vector<6x1x32xf32> to vector<6x32xf32>
    %40 = arith.addf %31, %35 : vector<6x32xf32>
    %41 = arith.addf %40, %39 : vector<6x32xf32>
    %42 = vector.broadcast %11 : vector<1x32xf32> to vector<6x32xf32>
    %43 = arith.addf %41, %42 : vector<6x32xf32>
    %cst_25 = arith.constant 0.000000e+00 : f32
    %44 = vector.broadcast %cst_25 : f32 to vector<6x32xf32>
    %45 = arith.cmpf oge, %43, %44 : vector<6x32xf32>
    %cst_26 = arith.constant 0.00999999977 : f32
    %46 = vector.broadcast %cst_26 : f32 to vector<6x32xf32>
    %47 = arith.mulf %46, %43 : vector<6x32xf32>
    %48 = arith.select %45, %43, %47 : vector<6x32xi1>, vector<6x32xf32>
    %cst_27 = arith.constant dense<0.000000e+00> : vector<6x32xf32>
    %49 = tpu.matmul %48, %4, %cst_27 {dimension_numbers = #tpu.dot_dimension_numbers<[1], [0], [0], [1], [0, 0, 1, 1], [], []>} : vector<6x32xf32>, vector<32x32xf32>, vector<6x32xf32> -> vector<6x32xf32>
    %50 = vector.broadcast %12 : vector<1x32xf32> to vector<6x32xf32>
    %51 = arith.addf %49, %50 : vector<6x32xf32>
    %52 = arith.addf %51, %27 : vector<6x32xf32>
    %cst_28 = arith.constant 0.000000e+00 : f32
    %53 = vector.broadcast %cst_28 : f32 to vector<6x32xf32>
    %54 = arith.cmpf oge, %52, %53 : vector<6x32xf32>
    %cst_29 = arith.constant 0.00999999977 : f32
    %55 = vector.broadcast %cst_29 : f32 to vector<6x32xf32>
    %56 = arith.mulf %55, %52 : vector<6x32xf32>
    %57 = arith.select %54, %52, %56 : vector<6x32xi1>, vector<6x32xf32>
    %58 = vector.shape_cast %57 : vector<6x32xf32> to vector<2x3x32xf32>
    %59 = vector.extract_strided_slice %58 {offsets = [0, 1, 0], sizes = [2, 1, 32], strides = [1, 1, 1]} : vector<2x3x32xf32> to vector<2x1x32xf32>
    %cst_30 = arith.constant dense<0.000000e+00> : vector<6x32xf32>
    %60 = tpu.matmul %57, %5, %cst_30 {dimension_numbers = #tpu.dot_dimension_numbers<[1], [0], [0], [1], [0, 0, 1, 1], [], []>} : vector<6x32xf32>, vector<32x32xf32>, vector<6x32xf32> -> vector<6x32xf32>
    %61 = vector.shape_cast %60 : vector<6x32xf32> to vector<2x3x32xf32>
    %cst_31 = arith.constant dense<0.000000e+00> : vector<6x32xf32>
    %62 = tpu.matmul %57, %6, %cst_31 {dimension_numbers = #tpu.dot_dimension_numbers<[1], [0], [0], [1], [0, 0, 1, 1], [], []>} : vector<6x32xf32>, vector<32x32xf32>, vector<6x32xf32> -> vector<6x32xf32>
    %63 = vector.shape_cast %62 : vector<6x32xf32> to vector<2x3x32xf32>
    %cst_32 = arith.constant dense<0.000000e+00> : vector<6x32xf32>
    %64 = tpu.matmul %57, %7, %cst_32 {dimension_numbers = #tpu.dot_dimension_numbers<[1], [0], [0], [1], [0, 0, 1, 1], [], []>} : vector<6x32xf32>, vector<32x32xf32>, vector<6x32xf32> -> vector<6x32xf32>
    %65 = vector.shape_cast %64 : vector<6x32xf32> to vector<2x3x32xf32>
    %66 = vector.extract_strided_slice %61 {offsets = [0, 0, 0], sizes = [2, 1, 32], strides = [1, 1, 1]} : vector<2x3x32xf32> to vector<2x1x32xf32>
    %67 = vector.extract_strided_slice %63 {offsets = [0, 1, 0], sizes = [2, 1, 32], strides = [1, 1, 1]} : vector<2x3x32xf32> to vector<2x1x32xf32>
    %68 = arith.addf %66, %67 : vector<2x1x32xf32>
    %69 = vector.extract_strided_slice %65 {offsets = [0, 2, 0], sizes = [2, 1, 32], strides = [1, 1, 1]} : vector<2x3x32xf32> to vector<2x1x32xf32>
    %70 = arith.addf %68, %69 : vector<2x1x32xf32>
    %71 = vector.shape_cast %13 : vector<1x32xf32> to vector<1x1x32xf32>
    %72 = vector.broadcast %71 : vector<1x1x32xf32> to vector<2x1x32xf32>
    %73 = arith.addf %70, %72 : vector<2x1x32xf32>
    %cst_33 = arith.constant 0.000000e+00 : f32
    %74 = vector.broadcast %cst_33 : f32 to vector<2x1x32xf32>
    %75 = arith.cmpf oge, %73, %74 : vector<2x1x32xf32>
    %cst_34 = arith.constant 0.00999999977 : f32
    %76 = vector.broadcast %cst_34 : f32 to vector<2x1x32xf32>
    %77 = arith.mulf %76, %73 : vector<2x1x32xf32>
    %78 = arith.select %75, %73, %77 : vector<2x1x32xi1>, vector<2x1x32xf32>
    %79 = vector.shape_cast %78 : vector<2x1x32xf32> to vector<2x32xf32>
    %cst_35 = arith.constant dense<0.000000e+00> : vector<2x32xf32>
    %80 = tpu.matmul %79, %8, %cst_35 {dimension_numbers = #tpu.dot_dimension_numbers<[1], [0], [0], [1], [0, 0, 1, 1], [], []>} : vector<2x32xf32>, vector<32x32xf32>, vector<2x32xf32> -> vector<2x32xf32>
    %81 = vector.broadcast %14 : vector<1x32xf32> to vector<2x32xf32>
    %82 = arith.addf %80, %81 : vector<2x32xf32>
    %83 = vector.shape_cast %82 : vector<2x32xf32> to vector<2x1x32xf32>
    %84 = arith.addf %83, %59 : vector<2x1x32xf32>
    %cst_36 = arith.constant 0.000000e+00 : f32
    %85 = vector.broadcast %cst_36 : f32 to vector<2x1x32xf32>
    %86 = arith.cmpf oge, %84, %85 : vector<2x1x32xf32>
    %cst_37 = arith.constant 0.00999999977 : f32
    %87 = vector.broadcast %cst_37 : f32 to vector<2x1x32xf32>
    %88 = arith.mulf %87, %84 : vector<2x1x32xf32>
    %89 = arith.select %86, %84, %88 : vector<2x1x32xi1>, vector<2x1x32xf32>
    %90 = vector.shape_cast %89 : vector<2x1x32xf32> to vector<2x32xf32>
    %cst_38 = arith.constant dense<0.000000e+00> : vector<2x4xf32>
    %91 = tpu.matmul %90, %9, %cst_38 {dimension_numbers = #tpu.dot_dimension_numbers<[1], [0], [0], [1], [0, 0, 1, 1], [], []>} : vector<2x32xf32>, vector<32x4xf32>, vector<2x4xf32> -> vector<2x4xf32>
    %92 = vector.broadcast %15 : vector<1x4xf32> to vector<2x4xf32>
    %93 = arith.addf %91, %92 : vector<2x4xf32>
    %c0_39 = arith.constant 0 : index
    %c0_40 = arith.constant 0 : index
    %94 = vector.load %arg5[%c0_39, %c0_40] : memref<2x4xf32, #tpu.memory_space<vmem>>, vector<2x4xf32>
    tpu.vector_store %arg5[%c0_39, %c0_40], %93 {strides = array<i32>} : memref<2x4xf32, #tpu.memory_space<vmem>>, vector<2x4xf32>,
    return
  }
  func.func @transform_0(%arg0: i32) -> (i32, i32) {
    %c0_i32 = arith.constant 0 : i32
    %c0_i32_0 = arith.constant 0 : i32
    %c0_i32_1 = arith.constant 0 : i32
    return %c0_i32, %c0_i32_0 : i32, i32
  }
  func.func @transform_1(%arg0: i32) -> (i32, i32) {
    %c0_i32 = arith.constant 0 : i32
    %c0_i32_0 = arith.constant 0 : i32
    %c0_i32_1 = arith.constant 0 : i32
    return %c0_i32, %c0_i32_0 : i32, i32
  }
  func.func @transform_2(%arg0: i32) -> (i32, i32) {
    %c0_i32 = arith.constant 0 : i32
    %c0_i32_0 = arith.constant 0 : i32
    %c0_i32_1 = arith.constant 0 : i32
    return %c0_i32, %c0_i32_0 : i32, i32
  }
  func.func @transform_3(%arg0: i32) -> (i32, i32) {
    %c0_i32 = arith.constant 0 : i32
    %c0_i32_0 = arith.constant 0 : i32
    %c0_i32_1 = arith.constant 0 : i32
    return %c0_i32, %c0_i32_0 : i32, i32
  }
  func.func @transform_4(%arg0: i32) -> (i32, i32) {
    %c0_i32 = arith.constant 0 : i32
    %c0_i32_0 = arith.constant 0 : i32
    %c0_i32_1 = arith.constant 0 : i32
    return %c0_i32, %c0_i32_0 : i32, i32
  }
}

</mosaic_0001>

<bundles_post_ra>
// kernel: tpu_custom_call.1
= control target key start
LH: loop header
LB: loop body
LE: loop exit
PB: predicated region body
PF: predicated region fallthrough
CT: control target
= control target key end

     0   :  { %v1860_v1 = vmov 0.0   ;;  %vm1861_vm0 = vmmov 0   ;;  %s2241_s0 = inlined_call_operand.vmem [shape: f32[18,24], index: 0, kind: input, shape index: {}]   ;;  %s2242_s1 = inlined_call_operand.vmem [shape: f32[280,32], index: 1, kind: input, shape index: {}]   ;;  %s2243_s2 = inlined_call_operand.vmem [shape: f32[32,4], index: 2, kind: input, shape index: {}]   ;;  %s2244_s3 = inlined_call_operand.vmem [shape: f32[6,32], index: 3, kind: input, shape index: {}]   ;;  %s2245_s4 = inlined_call_operand.hbm [shape: f32[2,4], index: 4, kind: output, shape index: {}]  }
   0x1   :  { %v20_v0 = vld [vmem:[%s2242_s1 + $0x10] sm:$0xff]  ;;  %1702 = vmatprep.subr.mxu0 %v1860_v1  ;;  %v19_v2 = vld [vmem:[%s2242_s1 + $0x8] sm:$0xff]  ;;  %1708 = vmatprep.mubr.msk.f32.mxu0 %vm1861_vm0, %v1860_v1  ;;  %v18_v4 = vld [vmem:[%s2242_s1] sm:$0xff] }
   0x2   :  { %1703 = vmatpush3.msra.mxu0 %v20_v0  ;;  %1717 = vmatprep.subr.mxu1 %v1860_v1  ;;  %v24_v3 = vld [vmem:[%s2242_s1 + $0x30] sm:$0xff] }
   0x3   :  { %1704 = vmatprep.subr.mxu0 %v1860_v1  ;;  %1718 = vmatpush3.msra.mxu1 %v24_v3 }
   0x4   :  { %9 = vsyncpa [#allocation3], 0  ;;  %1705 = vmatpush3.msra.mxu0 %v19_v2  ;;  %v63_v5 = vld [vmem:[%s2241_s0] sm:$0xff]  ;;  %vm70_vm1 = vcmask 195584   ;;  %1719 = vmatprep.subr.mxu1 %v1860_v1  ;;  %v28_v6 = vld [vmem:[%s2242_s1 + $0x50] sm:$0xff]  ;;  %v176_v17 = vlaneseq  ;;  %vm256_vm3 = vcmask 261120  }
   0x5   :  { %1706 = vmatprep.subr.mxu0 %v1860_v1  ;;  %1725 = vmatprep.mubr.msk.f32.mxu1 %vm1861_vm0, %v1860_v1  ;;  %v64_v7 = vld [vmem:[%s2241_s0 + $0x8] sm:$0xff]  ;;  %v65_v8 = vld [vmem:[%s2241_s0 + $0x10] sm:$0x3]  ;;  %v22_v11 = vld [vmem:[%s2242_s1 + $0x20] sm:$0xff]  ;;  %v1862_v15 = vmov 1966171168  }
   0x6   :  { %1707 = vmatpush3.msra.mxu0 %v18_v4  ;;  %v23_v9 = vld [vmem:[%s2242_s1 + $0x28] sm:$0xff]  ;;  %v26_v12 = vld [vmem:[%s2242_s1 + $0x40] sm:$0xff]  ;;  %v21_v13 = vld [vmem:[%s2242_s1 + $0x18] sm:$0xff]  ;;  %v174_v16 = vunpack.c.l.s4 %v1862_v15  ;;  %v177_v20 = vshrl.u32 %v176_v17, 7  ;;  %s1863_s28 = smov [#allocation2]  }
   0x7   :  { %1709 = vmatmul.mubr.msk.f32.vlgmr.msra.gmra.mxu0 %vm70_vm1, %v63_v5  ;;  %1734 = vmatprep.subr.mxu0 %v1860_v1  ;;  %v27_v10 = vld [vmem:[%s2242_s1 + $0x48] sm:$0xff]  ;;  %v25_v14 = vld [vmem:[%s2242_s1 + $0x38] sm:$0xff]  ;;  %v1621_v18 = vld [vmem:[%s2244_s3] ss:$0 sm:$0xff]  ;;  %s1613_s29 = sshll.u32 %s1863_s28, 4  ;;  %s1614_s29 = int_to_ptr.vmem [resolvable:$true] %s1613_s29 }
   0x8   :  { %1711 = vmatprep.mubr.msk.f32.mxu0 %vm1861_vm0, %v1860_v1  ;;  %1735 = vmatpush3.msra.mxu0 %v28_v6  ;;  %v175_v19 = vunpack.c.0.s8 %v174_v16  ;;  %v32_v27 = vld [vmem:[%s2242_s1 + $0x70] sm:$0xff]  ;;  %v31_v33 = vld [vmem:[%s2242_s1 + $0x68] sm:$0xff]  ;;  %v30_v40 = vld [vmem:[%s2242_s1 + $0x60] sm:$0xff]  ;;  %s1838_s30 = scalar_lea.vmem %s1614_s29, 32  ;;  %p1843_p1 = scmp.lt.s32.totalorder %s1614_s29, %s1614_s29 }
   0x9   :  { %1736 = vmatprep.subr.mxu0 %v1860_v1  ;;  %1720 = vmatpush3.msra.mxu1 %v23_v9  ;;  %v29_v50 = vld [vmem:[%s2242_s1 + $0x58] sm:$0xff]  ;;  %v36_v4 = vld [vmem:[%s2242_s1 + $0x90] sm:$0xff]  ;;  %v35_v5 = vld [vmem:[%s2242_s1 + $0x88] sm:$0xff]  ;;  %p1839_p0 = scmp.ne.s32.totalorder %s1614_s29, %s1838_s30  ;;  %p1844_p2 = scmp.lt.s32.totalorder %s1838_s30, %s1838_s30 }
   0xa   :  { %1737 = vmatpush3.msra.mxu0 %v27_v10  ;;  %1721 = vmatprep.subr.mxu1 %v1860_v1  ;;  %v1957_v23 = vsub.s32 %v175_v19, %v177_v20  ;;  %v34_v6 = vld [vmem:[%s2242_s1 + $0x80] sm:$0xff]  ;;  %v39_v9 = vld [vmem:[%s2242_s1 + $0xa8] sm:$0xff] }
   0xb   :  { %1712 = vmatmul.mubr.msk.f32.gmra.mxu0 %vm70_vm1, %v64_v7  ;;  %1738 = vmatprep.subr.mxu0 %v1860_v1  ;;  %v33_v7 = vld [vmem:[%s2242_s1 + $0x78] sm:$0xff]  ;;  %p1845_p3 = por %p1844_p2, %p1843_p1 }
   0xc   :  { %1714 = vmatprep.mubr.msk.f32.mxu0 %vm1861_vm0, %v1860_v1  ;;  %1722 = vmatpush3.msra.mxu1 %v22_v11 }
   0xd   :  { %1739 = vmatpush3.msra.mxu0 %v26_v12  ;;  %1723 = vmatprep.subr.mxu1 %v1860_v1  ;;  %v1634_v12 = vld [vmem:[%s2244_s3 + $0x1] ss:$0 sm:$0xff]  ;;  %p1846_p4 = pnand %p1845_p3, %p1839_p0 }
   0xe   :  { %1740 = vmatprep.subr.mxu0 %v1860_v1  ;;  %1724 = vmatpush3.msra.mxu1 %v21_v13  ;;  %v792_v17 = vcombine.high %v1634_v12, %v1634_v12 }
   0xf   :  { %1715 = vmatmul.mubr.msk.f32.gmra.mxu0 %vm70_vm1, %v65_v8  ;;  %1751 = vmatprep.subr.mxu1 %v1860_v1  ;;  %v40_v8 = vld [vmem:[%s2242_s1 + $0xb0] sm:$0xff]  ;;  %vm1605_vm1 = vcmask 25600  }
  0x10   :  { %1742 = vmatprep.mubr.msk.f32.mxu0 %vm1861_vm0, %v1860_v1  ;;  %1741 = vmatpush3.msra.mxu0 %v25_v14 }
  0x11   :  { %1768 = vmatprep.subr.mxu0 %v1860_v1 }
  0xc7   :  { %v146_v21 = vpop.f32.mrf.mxu0 }
  0xc8   :  { %v147_v22 = vadd.f32 %v1621_v18, %v146_v21 }
  0xc9   :  { %v1710_v24 = vpop.f32.mrf.mxu0 }
  0xca   :  { %vm160_vm2 = vcmp.ge.f32.partialorder %v147_v22, 0.0  ;;  %v163_v25 = vmul.f32 0.01, %v147_v22 }
  0xcb   :  { %v151_v26 = vpop.f32.mrf.mxu0 }
  0xcc   :  { %v166_v28 = vsel %vm160_vm2, %v147_v22, %v163_v25  ;;  %v152_v29 = vadd.f32 %v1621_v18, %v151_v26 }
  0xcd   :  { %v172_v30 = vcombine.high %v166_v28, %v166_v28  ;;  %v179_v31 = vrot.slane %v166_v28, %v1957_v23  ;;  %v1713_v32 = vpop.f32.mrf.mxu0  ;;  %1726 = vmatmul.mubr.msk.f32.vlgmr.msra.gmra.mxu1 %vm256_vm3, %v166_v28  ;;  %1743 = vmatmul.mubr.msk.f32.vlgmr.msra.gmra.mxu0 %vm256_vm3, %v166_v28 }
  0xce   :  { %vm161_vm4 = vcmp.ge.f32.partialorder %v152_v29, 0.0  ;;  %v164_v34 = vmul.f32 0.01, %v152_v29  ;;  %1752 = vmatpush3.msra.mxu1 %v32_v27  ;;  %1728 = vmatprep.mubr.msk.f32.mxu1 %vm1861_vm0, %v1860_v1  ;;  %v2055_v32 = vrot.slane %v792_v17, %v1957_v23 }
  0xcf   :  { %v186_v35 = vrot.slane %v172_v30, %v1957_v23  ;;  %v187_v36 = vcombine.high %v179_v31, %v179_v31  ;;  %v156_v37 = vpop.f32.mrf.mxu0  ;;  %1753 = vmatprep.subr.mxu1 %v1860_v1  ;;  %1745 = vmatprep.mubr.msk.f32.mxu0 %vm1861_vm0, %v1860_v1 }
  0xd0   :  { %v167_v38 = vsel %vm161_vm4, %v152_v29, %v164_v34  ;;  %v157_v39 = vadd.f32 %v1621_v18, %v156_v37  ;;  %1754 = vmatpush3.msra.mxu1 %v31_v33  ;;  %1769 = vmatpush3.msra.mxu0 %v36_v4  ;;  %v799_v18 = vrot.slane %v1634_v12, %v1957_v23 }
  0xd1   :  { %v188_v41 = vcombine.high %v186_v35, %v186_v35  ;;  %v202_v42 = vrot.slane %v187_v36, %v1957_v23  ;;  %v211_v43 = vcombine.high %v167_v38, %v167_v38  ;;  %v218_v44 = vrot.slane %v167_v38, %v1957_v23  ;;  %v1716_v45 = vpop.f32.mrf.mxu0  ;;  %1729 = vmatmul.mubr.msk.f32.gmra.mxu1 %vm256_vm3, %v167_v38 }
  0xd2   :  { %vm162_vm5 = vcmp.ge.f32.partialorder %v157_v39, 0.0  ;;  %v165_v46 = vmul.f32 0.01, %v157_v39  ;;  %1746 = vmatmul.mubr.msk.f32.gmra.mxu0 %vm256_vm3, %v167_v38  ;;  %1755 = vmatprep.subr.mxu1 %v1860_v1  ;;  %v195_v47 = vrot.slane %v186_v35, %v1957_v23  ;;  %v807_v30 = vcombine.high %v799_v18, %v799_v18 }
  0xd3   :  { %v225_v48 = vrot.slane %v211_v43, %v1957_v23  ;;  %v233_v49 = vrot.slane %v218_v44, %v1957_v23  ;;  %1756 = vmatpush3.msra.mxu1 %v30_v40  ;;  %1731 = vmatprep.mubr.msk.f32.mxu1 %vm1861_vm0, %v1860_v1  ;;  %v209_v51 = vrot.slane %v188_v41, %v1957_v23 }
  0xd4   :  { %1748 = vmatprep.mubr.msk.f32.mxu0 %vm1861_vm0, %v1860_v1  ;;  %v168_v52 = vsel %vm162_vm5, %v157_v39, %v165_v46  ;;  %1757 = vmatprep.subr.mxu1 %v1860_v1  ;;  %v991_v53 = vcombine.low %v202_v42, %v195_v47  ;;  %v2052_v31 = vrot.slane %v799_v18, %v1957_v23 }
  0xd5   :  { %v226_v54 = vcombine.high %v225_v48, %v225_v48  ;;  %v248_v55 = vrot.slane %v168_v52, %v1957_v23  ;;  %1732 = vmatmul.mubr.msk.f32.gmra.mxu1 %vm256_vm3, %v168_v52  ;;  %v1637_v56 = vcombine.high %v209_v51, %v233_v49  ;;  %1770 = vmatprep.subr.mxu0 %v1860_v1 }
  0xd6   :  { %1749 = vmatmul.mubr.msk.f32.gmra.mxu0 %vm256_vm3, %v168_v52  ;;  %1758 = vmatpush3.msra.mxu1 %v29_v50  ;;  %v1000_v57 = vrot.slane %v991_v53, %v1957_v23  ;;  %v2066_v45 = vrot.slane %v807_v30, %v1957_v23  ;;  %v822_v46 = vrot.slane %v2055_v32, %v1957_v23 }
  0xd7   :  { %v255_v58 = vrot.slane %v248_v55, %v1957_v23  ;;  %1759 = vmatprep.mubr.msk.f32.mxu1 %vm1861_vm0, %v1860_v1  ;;  %1776 = vmatprep.mubr.msk.f32.mxu0 %vm1861_vm0, %v1860_v1  ;;  %v240_v59 = vrot.slane %v226_v54, %v1957_v23  ;;  %v1007_v60 = vrot.slane %v1637_v56, %v1957_v23 }
  0xd8   :  { %1779 = vmatprep.subr.mxu1 %v1860_v1  ;;  %1771 = vmatpush3.msra.mxu0 %v35_v5  ;;  %v837_v47 = vcombine.high %v2052_v31, %v2052_v31 }
  0xd9   :  { %1760 = vmatmul.mubr.msk.f32.vlgmr.msra.gmra.mxu1 %vm256_vm3, %v166_v28  ;;  %v993_v61 = vcombine.low %v240_v59, %v255_v58  ;;  %v1015_v62 = vcombine.low %v1000_v57, %v1007_v60  ;;  %1772 = vmatprep.subr.mxu0 %v1860_v1 }
  0xda   :  { %1762 = vmatprep.mubr.msk.f32.mxu1 %vm1861_vm0, %v1860_v1  ;;  %1773 = vmatpush3.msra.mxu0 %v34_v6 }
  0xdb   :  { %v1014_v63 = vrot.slane %v993_v61, %v1957_v23  ;;  %v1022_v0 = vrot.slane %v1015_v62, %v1957_v23  ;;  %1774 = vmatprep.subr.mxu0 %v1860_v1  ;;  %1780 = vmatpush3.msra.mxu1 %v40_v8 }
  0xdc   :  { %1775 = vmatpush3.msra.mxu0 %v33_v7  ;;  %1781 = vmatprep.subr.mxu1 %v1860_v1 }
  0xdd   :  { %1763 = vmatmul.mubr.msk.f32.gmra.mxu1 %vm256_vm3, %v167_v38  ;;  %v1029_v2 = vrot.slane %v1014_v63, %v1957_v23  ;;  %1790 = vmatprep.subr.mxu0 %v1860_v1 }
  0xde   :  { %1765 = vmatprep.mubr.msk.f32.mxu1 %vm1861_vm0, %v1860_v1  ;;  %1782 = vmatpush3.msra.mxu1 %v39_v9 }
  0xdf   :  { %v2015_v3 = vcombine.low %v1022_v0, %v1029_v2  ;;  %1783 = vmatprep.subr.mxu1 %v1860_v1  ;;  %v838_v0 = vcombine.high %v2066_v45, %v2066_v45  ;;  %v808_v2 = vcombine.high %v2055_v32, %v2055_v32 }
  0xe1   :  { %1766 = vmatmul.mubr.msk.f32.gmra.mxu1 %vm256_vm3, %v168_v52 }
  0xe2   :  { %1787 = vmatprep.mubr.msk.f32.mxu1 %vm1861_vm0, %v1860_v1 }
 0x18d   :  { %v329_v10 = vpop.f32.mrf.mxu1  ;;  %v494_v11 = vpop.f32.mrf.mxu0 }
 0x18e   :  { %v351_v13 = vrot.slane %v329_v10, %v1957_v23  ;;  %v511_v14 = vcombine.high %v494_v11, %v494_v11  ;;  %v344_v19 = vcombine.high %v329_v10, %v329_v10  ;;  %v518_v21 = vrot.slane %v494_v11, %v1957_v23 }
 0x18f   :  { %v1727_v15 = vpop.f32.mrf.mxu1  ;;  %v1744_v16 = vpop.f32.mrf.mxu0 }
 0x190   :  { %v359_v20 = vcombine.high %v351_v13, %v351_v13  ;;  %v525_v22 = vrot.slane %v511_v14, %v1957_v23  ;;  %v358_v33 = vrot.slane %v344_v19, %v1957_v23  ;;  %v526_v35 = vcombine.high %v518_v21, %v518_v21 }
 0x191   :  { %v334_v24 = vpop.f32.mrf.mxu1  ;;  %v366_v53 = vrot.slane %v351_v13, %v1957_v23 }
 0x192   :  { %v499_v25 = vpop.f32.mrf.mxu0  ;;  %v383_v26 = vcombine.high %v334_v24, %v334_v24  ;;  %v380_v34 = vrot.slane %v359_v20, %v1957_v23  ;;  %v527_v36 = vcombine.high %v525_v22, %v525_v22  ;;  %v390_v39 = vrot.slane %v334_v24, %v1957_v23 }
 0x193   :  { %v550_v27 = vcombine.high %v499_v25, %v499_v25  ;;  %v1730_v28 = vpop.f32.mrf.mxu1  ;;  %v557_v41 = vrot.slane %v499_v25, %v1957_v23  ;;  %v373_v48 = vrot.slane %v358_v33, %v1957_v23  ;;  %v541_v50 = vrot.slane %v526_v35, %v1957_v23 }
 0x194   :  { %v1747_v29 = vpop.f32.mrf.mxu0  ;;  %v397_v40 = vrot.slane %v383_v26, %v1957_v23  ;;  %v382_v49 = vcombine.high %v380_v34, %v380_v34  ;;  %v548_v51 = vrot.slane %v527_v36, %v1957_v23  ;;  %v534_v54 = vrot.slane %v525_v22, %v1957_v23 }
 0x195   :  { %v339_v37 = vpop.f32.mrf.mxu1  ;;  %v564_v42 = vrot.slane %v550_v27, %v1957_v23  ;;  %v398_v57 = vcombine.high %v390_v39, %v390_v39  ;;  %v572_v60 = vrot.slane %v557_v41, %v1957_v23  ;;  %v381_v4 = vcombine.high %v373_v48, %v373_v48 }
 0x196   :  { %v2059_v38 = vpop.f32.mrf.mxu0  ;;  %v399_v58 = vcombine.high %v397_v40, %v397_v40  ;;  %v549_v5 = vcombine.high %v548_v51, %v548_v51  ;;  %v775_v6 = vadd.f32 %v541_v50, %v366_v53  ;;  %v776_v7 = vadd.f32 %v534_v54, %v382_v49 }
 0x197   :  { %v1733_v43 = vpop.f32.mrf.mxu1  ;;  %v565_v59 = vcombine.high %v564_v42, %v564_v42  ;;  %v413_v13 = vrot.slane %v398_v57, %v1957_v23  ;;  %v580_v15 = vcombine.high %v572_v60, %v572_v60  ;;  %v406_v22 = vrot.slane %v397_v40, %v1957_v23 }
 0x198   :  { %v1750_v44 = vpop.f32.mrf.mxu0  ;;  %v420_v16 = vrot.slane %v399_v58, %v1957_v23  ;;  %v587_v24 = vrot.slane %v2059_v38, %v1957_v23  ;;  %v777_v26 = vadd.f32 %v549_v5, %v381_v4  ;;  %v836_v37 = vrot.slane %v808_v2, %v1957_v23 }
 0x199   :  { %v667_v52 = vpop.f32.mrf.mxu1  ;;  %v579_v14 = vrot.slane %v565_v59, %v1957_v23  ;;  %v778_v40 = vadd.f32 %v580_v15, %v413_v13  ;;  %v44_v13 = vld [vmem:[%s2242_s1 + $0xd0] sm:$0xff]  ;;  %v38_v15 = vld [vmem:[%s2242_s1 + $0xa0] sm:$0xff] }
 0x19a   :  { %v684_v55 = vcombine.high %v667_v52, %v667_v52  ;;  %v691_v56 = vrot.slane %v667_v52, %v1957_v23  ;;  %v421_v34 = vcombine.high %v420_v16, %v420_v16  ;;  %v594_v43 = vrot.slane %v587_v24, %v1957_v23  ;;  %1784 = vmatpush3.msra.mxu1 %v38_v15  ;;  %v42_v16 = vld [vmem:[%s2242_s1 + $0xc0] sm:$0xff] }
 0x19b   :  { %v1761_v61 = vpop.f32.mrf.mxu1  ;;  %v779_v38 = vadd.f32 %v579_v14, %v406_v22  ;;  %v43_v14 = vld [vmem:[%s2242_s1 + $0xc8] sm:$0xff]  ;;  %1785 = vmatprep.subr.mxu1 %v1860_v1  ;;  %v1641_v15 = vld [vmem:[%s2244_s3 + $0x4] ss:$0 sm:$0xff] }
 0x19c   :  { %v698_v62 = vrot.slane %v684_v55, %v1957_v23  ;;  %v706_v63 = vrot.slane %v691_v56, %v1957_v23  ;;  %v780_v52 = vadd.f32 %v594_v43, %v421_v34  ;;  %v50_v34 = vld [vmem:[%s2242_s1 + $0x100] sm:$0xff] }
 0x19d   :  { %v672_v8 = vpop.f32.mrf.mxu1 }
 0x19e   :  { %v699_v9 = vcombine.high %v698_v62, %v698_v62  ;;  %v714_v10 = vcombine.high %v706_v63, %v706_v63  ;;  %v715_v11 = vcombine.high %v672_v8, %v672_v8  ;;  %v722_v12 = vrot.slane %v672_v8, %v1957_v23 }
 0x19f   :  { %v1764_v17 = vpop.f32.mrf.mxu1 }
 0x1a0   :  { %v713_v18 = vrot.slane %v699_v9, %v1957_v23  ;;  %v781_v19 = vadd.f32 %v775_v6, %v714_v10  ;;  %v729_v20 = vrot.slane %v715_v11, %v1957_v23  ;;  %v730_v21 = vcombine.high %v722_v12, %v722_v12  ;;  %v37_v17 = vld [vmem:[%s2242_s1 + $0x98] sm:$0xff] }
 0x1a1   :  { %v737_v25 = vrot.slane %v722_v12, %v1957_v23  ;;  %v677_v27 = vpop.f32.mrf.mxu1  ;;  %1786 = vmatpush3.msra.mxu1 %v37_v17 }
 0x1a2   :  { %v782_v28 = vadd.f32 %v776_v7, %v713_v18  ;;  %v845_v29 = vadd.f32 %v2052_v31, %v781_v19  ;;  %v744_v30 = vrot.slane %v729_v20, %v1957_v23  ;;  %v751_v33 = vrot.slane %v730_v21, %v1957_v23  ;;  %v41_v18 = vld [vmem:[%s2242_s1 + $0xb8] sm:$0xff]  ;;  %1801 = vmatprep.subr.mxu1 %v1860_v1  ;;  %v1635_v19 = vld [vmem:[%s2244_s3 + $0x2] ss:$0 sm:$0xff] }
 0x1a3   :  { %v783_v35 = vadd.f32 %v777_v26, %v737_v25  ;;  %v760_v36 = vrot.slane %v677_v27, %v1957_v23  ;;  %v1767_v39 = vpop.f32.mrf.mxu1  ;;  %v48_v26 = vld [vmem:[%s2242_s1 + $0xf0] sm:$0xff] }
 0x1a4   :  { %v846_v41 = vadd.f32 %v2066_v45, %v782_v28  ;;  %v752_v42 = vcombine.high %v744_v30, %v744_v30  ;;  %v753_v44 = vcombine.high %v751_v33, %v751_v33  ;;  %v857_v49 = vmul.f32 0.01, %v845_v29  ;;  %v47_v28 = vld [vmem:[%s2242_s1 + $0xe8] sm:$0xff]  ;;  %v52_v30 = vld [vmem:[%s2242_s1 + $0x110] sm:$0xff] }
 0x1a5   :  { %v847_v31 = vadd.f32 %v837_v47, %v783_v35  ;;  %v761_v48 = vcombine.high %v760_v36, %v760_v36  ;;  %vm851_vm7 = vcmp.ge.f32.partialorder %v845_v29, 0.0  ;;  %v51_v33 = vld [vmem:[%s2242_s1 + $0x108] sm:$0xff]  ;;  %v49_v35 = vld [vmem:[%s2242_s1 + $0xf8] sm:$0xff] }
 0x1a6   :  { %vm852_vm6 = vcmp.ge.f32.partialorder %v846_v41, 0.0  ;;  %v858_v50 = vmul.f32 0.01, %v846_v41  ;;  %v785_v51 = vadd.f32 %v779_v38, %v752_v42  ;;  %v784_v53 = vadd.f32 %v778_v40, %v753_v44 }
 0x1a7   :  { %v768_v54 = vrot.slane %v761_v48, %v1957_v23  ;;  %v859_v57 = vmul.f32 0.01, %v847_v31  ;;  %v863_v59 = vsel %vm851_vm7, %v845_v29, %v857_v49  ;;  %vm853_vm8 = vcmp.ge.f32.partialorder %v847_v31, 0.0  ;;  %v45_v29 = vld [vmem:[%s2242_s1 + $0xd8] sm:$0xff] }
 0x1a8   :  { %v849_v55 = vadd.f32 %v822_v46, %v785_v51  ;;  %v864_v45 = vsel %vm852_vm6, %v846_v41, %v858_v50  ;;  %v848_v56 = vadd.f32 %v838_v0, %v784_v53 }
 0x1a9   :  { %v786_v58 = vadd.f32 %v780_v52, %v768_v54  ;;  %v879_v62 = vcombine.low %v863_v59, %v864_v45  ;;  %v865_v63 = vsel %vm853_vm8, %v847_v31, %v859_v57 }
 0x1aa   :  { %vm854_vm9 = vcmp.ge.f32.partialorder %v848_v56, 0.0  ;;  %v860_v47 = vmul.f32 0.01, %v848_v56  ;;  %v861_v60 = vmul.f32 0.01, %v849_v55  ;;  %vm855_vm10 = vcmp.ge.f32.partialorder %v849_v55, 0.0 }
 0x1ab   :  { %v850_v61 = vadd.f32 %v836_v37, %v786_v58  ;;  %v888_v46 = vrot.slane %v879_v62, %v1957_v23 }
 0x1ac   :  { %v866_v2 = vsel %vm854_vm9, %v848_v56, %v860_v47  ;;  %v867_v6 = vsel %vm855_vm10, %v849_v55, %v861_v60  ;;  %v60_v60 = vld [vmem:[%s2244_s3 + $0x3] sm:$0x1] }
 0x1ad   :  { %vm856_vm11 = vcmp.ge.f32.partialorder %v850_v61, 0.0  ;;  %v862_v4 = vmul.f32 0.01, %v850_v61  ;;  %v880_v5 = vcombine.low %v865_v63, %v866_v2 }
 0x1af   :  { %v868_v32 = vsel %vm856_vm11, %v850_v61, %v862_v4  ;;  %v895_v0 = vrot.slane %v880_v5, %v1957_v23 }
 0x1b0   :  { %v881_v7 = vcombine.low %v867_v6, %v868_v32 }
 0x1b1   :  { %v903_v8 = vcombine.low %v888_v46, %v895_v0 }
 0x1b2   :  { %v902_v9 = vrot.slane %v881_v7, %v1957_v23 }
 0x1b3   :  { %v910_v10 = vrot.slane %v903_v8, %v1957_v23 }
 0x1b4   :  { %v917_v11 = vrot.slane %v902_v9, %v1957_v23 }
 0x1b6   :  { %v918_v12 = vcombine.low %v910_v10, %v917_v11  ;;  %v56_v10 = vld [vmem:[%s2243_s2 + $0x18] sm:$0xff]  ;;  %v55_v11 = vld [vmem:[%s2243_s2 + $0x10] sm:$0xff] }
 0x1b8   :  { %1777 = vmatmul.mubr.msk.f32.vlgmr.msra.gmra.mxu0 %vm256_vm3, %v918_v12  ;;  %v54_v12 = vld [vmem:[%s2243_s2 + $0x8] sm:$0xff] }
 0x1b9   :  { %1798 = vmatprep.mubr.msk.f32.mxu0 %vm1861_vm0, %v1860_v1  ;;  %1791 = vmatpush3.msra.mxu0 %v44_v13  ;;  %v53_v13 = vld [vmem:[%s2243_s2] sm:$0xff] }
 0x1ba   :  { %1792 = vmatprep.subr.mxu0 %v1860_v1 }
 0x1bb   :  { %1793 = vmatpush3.msra.mxu0 %v43_v14 }
 0x1bc   :  { %1794 = vmatprep.subr.mxu0 %v1860_v1 }
 0x1bd   :  { %1795 = vmatpush3.msra.mxu0 %v42_v16 }
 0x1be   :  { %1796 = vmatprep.subr.mxu0 %v1860_v1 }
 0x1bf   :  { %1797 = vmatpush3.msra.mxu0 %v41_v18 }
 0x1c0   :  { %1812 = vmatprep.subr.mxu0 %v1860_v1 }
 0x278   :  { %v987_v20 = vpop.f32.mrf.mxu0 }
 0x279   :  { %v988_v21 = vadd.f32 %v1635_v19, %v987_v20 }
 0x27a   :  { %v1778_v22 = vpop.f32.mrf.mxu0 }
 0x27b   :  { %v1032_v24 = vadd.f32 %v2015_v3, %v988_v21  ;;  %v46_v3 = vld [vmem:[%s2242_s1 + $0xe0] sm:$0xff] }
 0x27d   :  { %vm1033_vm12 = vcmp.ge.f32.partialorder %v1032_v24, 0.0  ;;  %v1034_v25 = vmul.f32 0.01, %v1032_v24 }
 0x27f   :  { %v2145_v27 = vsel %vm1033_vm12, %v1032_v24, %v1034_v25 }
 0x280   :  { %1788 = vmatmul.mubr.msk.f32.vlgmr.msra.gmra.mxu1 %vm256_vm3, %v2145_v27  ;;  %1799 = vmatmul.mubr.msk.f32.vlgmr.msra.gmra.mxu0 %vm256_vm3, %v2145_v27  ;;  %v1044_v14 = vrot.slane %v2145_v27, %v1957_v23  ;;  %v1037_v16 = vcombine.high %v2145_v27, %v2145_v27 }
 0x281   :  { %1802 = vmatpush3.msra.mxu1 %v48_v26  ;;  %1809 = vmatprep.mubr.msk.f32.mxu1 %vm1861_vm0, %v1860_v1 }
 0x282   :  { %1803 = vmatprep.subr.mxu1 %v1860_v1  ;;  %1820 = vmatprep.mubr.msk.f32.mxu0 %vm1861_vm0, %v1860_v1  ;;  %v1052_v18 = vcombine.high %v1044_v14, %v1044_v14  ;;  %v1051_v21 = vrot.slane %v1037_v16, %v1957_v23 }
 0x283   :  { %1804 = vmatpush3.msra.mxu1 %v47_v28  ;;  %1813 = vmatpush3.msra.mxu0 %v52_v30 }
 0x284   :  { %1805 = vmatprep.subr.mxu1 %v1860_v1  ;;  %1814 = vmatprep.subr.mxu0 %v1860_v1  ;;  %v1059_v26 = vrot.slane %v1051_v21, %v1957_v23 }
 0x285   :  { %1806 = vmatpush3.msra.mxu1 %v46_v3  ;;  %1815 = vmatpush3.msra.mxu0 %v51_v33 }
 0x286   :  { %1807 = vmatprep.subr.mxu1 %v1860_v1  ;;  %1816 = vmatprep.subr.mxu0 %v1860_v1 }
 0x287   :  { %1808 = vmatpush3.msra.mxu1 %v45_v29  ;;  %1817 = vmatpush3.msra.mxu0 %v50_v34 }
 0x288   :  { %1810 = vmatmul.mubr.msk.f32.vlgmr.msra.gmra.mxu1 %vm256_vm3, %v2145_v27  ;;  %1823 = vmatprep.subr.mxu1 %v1860_v1 }
 0x289   :  { %1831 = vmatprep.mubr.msk.f32.mxu1 %vm1861_vm0, %v1860_v1  ;;  %1818 = vmatprep.subr.mxu0 %v1860_v1 }
 0x28a   :  { %1819 = vmatpush3.msra.mxu0 %v49_v35  ;;  %1824 = vmatpush3.msra.mxu1 %v56_v10 }
 0x28b   :  { %1825 = vmatprep.subr.mxu1 %v1860_v1 }
 0x28c   :  { %1826 = vmatpush3.msra.mxu1 %v55_v11 }
 0x28d   :  { %1827 = vmatprep.subr.mxu1 %v1860_v1 }
 0x28e   :  { %1828 = vmatpush3.msra.mxu1 %v54_v12 }
 0x28f   :  { %1829 = vmatprep.subr.mxu1 %v1860_v1  ;;  %v1066_v1 = vrot.slane %v1052_v18, %v1957_v23 }
 0x290   :  { %1830 = vmatpush3.msra.mxu1 %v53_v13 }
 0x340   :  { %v1137_v36 = vpop.f32.mrf.mxu1  ;;  %v1233_v37 = vpop.f32.mrf.mxu0 }
 0x341   :  { %v1148_v39 = vrot.slane %v1137_v36, %v1957_v23  ;;  %v1245_v40 = vrot.slane %v1233_v37, %v1957_v23  ;;  %v1238_v43 = vcombine.high %v1233_v37, %v1233_v37 }
 0x342   :  { %v1789_v38 = vpop.f32.mrf.mxu1  ;;  %v1800_v41 = vpop.f32.mrf.mxu0 }
 0x343   :  { %v1149_v42 = vcombine.high %v1148_v39, %v1148_v39  ;;  %v1253_v44 = vcombine.high %v1245_v40, %v1245_v40  ;;  %v1252_v49 = vrot.slane %v1238_v43, %v1957_v23  ;;  %v1156_v54 = vrot.slane %v1148_v39, %v1957_v23  ;;  %v1643_v39 = vld [vmem:[%s2244_s3 + $0x5] ss:$0 sm:$0xff] }
 0x345   :  { %v1163_v31 = vrot.slane %v1149_v42, %v1957_v23  ;;  %v1267_v50 = vrot.slane %v1253_v44, %v1957_v23  ;;  %v1260_v57 = vrot.slane %v1252_v49, %v1957_v23 }
 0x347   :  { %v1164_v55 = vcombine.high %v1163_v31, %v1163_v31  ;;  %v1374_v58 = vadd.f32 %v1267_v50, %v1156_v54 }
 0x348   :  { %v1336_v48 = vpop.f32.mrf.mxu1 }
 0x349   :  { %v1341_v51 = vcombine.high %v1336_v48, %v1336_v48  ;;  %v1348_v52 = vrot.slane %v1336_v48, %v1957_v23  ;;  %v1375_v61 = vadd.f32 %v1260_v57, %v1164_v55 }
 0x34a   :  { %v1811_v53 = vpop.f32.mrf.mxu1 }
 0x34b   :  { %v1355_v45 = vrot.slane %v1341_v51, %v1957_v23  ;;  %v1363_v56 = vrot.slane %v1348_v52, %v1957_v23 }
 0x34d   :  { %v1356_v59 = vcombine.high %v1355_v45, %v1355_v45  ;;  %v1371_v47 = vcombine.high %v1363_v56, %v1363_v56 }
 0x34f   :  { %v1370_v62 = vrot.slane %v1356_v59, %v1957_v23  ;;  %v1376_v63 = vadd.f32 %v1374_v58, %v1371_v47 }
 0x351   :  { %v1377_v2 = vadd.f32 %v1375_v61, %v1370_v62  ;;  %v1378_v4 = vadd.f32 %v1376_v63, %v60_v60 }
 0x353   :  { %v1379_v5 = vadd.f32 %v1377_v2, %v60_v60  ;;  %v1382_v6 = vmul.f32 0.01, %v1378_v4  ;;  %vm1380_vm13 = vcmp.ge.f32.partialorder %v1378_v4, 0.0 }
 0x355   :  { %vm1381_vm14 = vcmp.ge.f32.partialorder %v1379_v5, 0.0  ;;  %v1383_v32 = vmul.f32 0.01, %v1379_v5  ;;  %v1384_v46 = vsel %vm1380_vm13, %v1378_v4, %v1382_v6 }
 0x357   :  { %v1385_v0 = vsel %vm1381_vm14, %v1379_v5, %v1383_v32 }
 0x358   :  { %v1392_v7 = vcombine.low %v1384_v46, %v1385_v0 }
 0x35a   :  { %v1399_v8 = vrot.slane %v1392_v7, %v1957_v23 }
 0x35c   :  { %v1406_v9 = vrot.slane %v1399_v8, %v1957_v23 }
 0x35e   :  { %1821 = vmatmul.mubr.msk.f32.vlgmr.msra.gmra.mxu0 %vm256_vm3, %v1406_v9 }
 0x41e   :  { %v1475_v17 = vpop.f32.mrf.mxu0 }
 0x41f   :  { %v1476_v19 = vadd.f32 %v1641_v15, %v1475_v17 }
 0x420   :  { %v1822_v20 = vpop.f32.mrf.mxu0 }
 0x421   :  { %v1486_v22 = vrot.slane %v1476_v19, %v1957_v23 }
 0x423   :  { %v1487_v24 = vcombine.high %v1486_v22, %v1486_v22  ;;  %v1494_v25 = vrot.slane %v1486_v22, %v1957_v23 }
 0x425   :  { %v1501_v28 = vrot.slane %v1487_v24, %v1957_v23  ;;  %v1504_v3 = vadd.f32 %v1494_v25, %v1066_v1 }
 0x427   :  { %v1505_v29 = vadd.f32 %v1501_v28, %v1059_v26  ;;  %v1508_v27 = vmul.f32 0.01, %v1504_v3  ;;  %vm1506_vm15 = vcmp.ge.f32.partialorder %v1504_v3, 0.0 }
 0x429   :  { %vm1507_vm0 = vcmp.ge.f32.partialorder %v1505_v29, 0.0  ;;  %v1509_v30 = vmul.f32 0.01, %v1505_v29  ;;  %v1510_v33 = vsel %vm1506_vm15, %v1504_v3, %v1508_v27 }
 0x42b   :  { %v1511_v34 = vsel %vm1507_vm0, %v1505_v29, %v1509_v30 }
 0x42c   :  { %v1518_v35 = vcombine.low %v1510_v33, %v1511_v34 }
 0x42e   :  { %v1525_v36 = vrot.slane %v1518_v35, %v1957_v23 }
 0x430   :  { %v1532_v37 = vrot.slane %v1525_v36, %v1957_v23 }
 0x432   :  { %1832 = vmatmul.mubr.msk.f32.vlgmr.msra.gmra.mxu1 %vm256_vm3, %v1532_v37 }
 0x4f2   :  { %v1601_v40 = vpop.f32.mrf.mxu1 }
 0x4f3   :  { %v1602_v38 = vadd.f32 %v1643_v39, %v1601_v40 }
 0x4f4   :  { %v1833_v41 = vpop.f32.mrf.mxu1 }
 0x4f5   :  { %1606 = vst.msk [vmem:[#allocation2] sm:$0x3] %vm1605_vm1, %v1602_v38 }
 0x4f6   :  { %1849 = shalt.err (!%p1846_p4)
}
 0x4f7   :  { %1616 = dma.vmem_to_hbm [thread:$0]  %s1614_s29, 32, %s2245_s4, [#allocation3]  }
 0x4f8   :  { %1858 = dma.done.wait [#allocation3], 32  }
 0x4f9   :  { %1859 = vsyncadd [#allocation3], 4294967264 }
 0x4fa   :  { %1620 = vsyncpa [#allocation3], 1 }

</bundles_post_ra>
